<compile_context>
chip_gen: v5e
topology: v5e:2x2
jax: 0.10.0
libtpu: 0.0.40
codegen_flags: <defaults>
</compile_context>

<pallas_src>
import functools
import math

import jax
import jax.numpy as jnp
from jax.experimental import pallas as pl
from jax.experimental.pallas import tpu as pltpu


# ----------------------------------------------------------------------------
# Shared helpers
# ----------------------------------------------------------------------------

def _layer_norm(x, g, b, eps):
    """LayerNorm over the last dim (f32 math)."""
    mu = jnp.mean(x, axis=-1, keepdims=True)
    var = jnp.mean(jnp.square(x - mu), axis=-1, keepdims=True)
    return (x - mu) * jax.lax.rsqrt(var + eps) * g + b


# ----------------------------------------------------------------------------
# Fused encoder kernel: grid = (batch, num_layers)
# ----------------------------------------------------------------------------

def _make_encoder_kernel(cfg, seq):
    h = cfg.hidden_size
    nh = cfg.num_heads
    dh = h // nh
    nl = cfg.num_layers
    eps = cfg.layer_norm_eps

    def kernel(emb_ref, mask_ref, wqkv_ref, bqkv_ref, wo_ref, bo_ref,
               g1_ref, b1_ref, wi_ref, bi_ref, wf_ref, bf_ref,
               g2_ref, b2_ref, wqa_ref, bqa_ref,
               x_ref, sl_ref, el_ref, ctx_sc):
        l = pl.program_id(1)

        # Layer 0: seed the resident activation block with the (already
        # LayerNorm'd) embedding tile for this batch element.
        @pl.when(l == 0)
        def _():
            x_ref[...] = emb_ref[...]

        x = x_ref[...]                                       # [S, H] f32

        # ---- self-attention: fused QKV matmul (bf16 MXU, f32 acc) ----------
        # 1/sqrt(dh) is pre-folded into the Q columns of wqkv.
        qkv = (jnp.dot(x.astype(jnp.bfloat16), wqkv_ref[0],
                       preferred_element_type=jnp.float32)
               + bqkv_ref[0])                                # [S, 3H] f32
        mask = mask_ref[0]                                   # [1, S] additive

        for hh in range(nh):                                 # static unroll
            q = qkv[:, hh * dh:(hh + 1) * dh].astype(jnp.bfloat16)
            k = qkv[:, h + hh * dh:h + (hh + 1) * dh].astype(jnp.bfloat16)
            v = qkv[:, 2 * h + hh * dh:2 * h + (hh + 1) * dh].astype(
                jnp.bfloat16)
            # bf16 x bf16 -> f32 score matmul; mask add + softmax in f32.
            s = jax.lax.dot_general(
                q, k, (((1,), (1,)), ((), ())),
                preferred_element_type=jnp.float32)          # [S, S]
            s = s + mask
            m = jnp.max(s, axis=-1, keepdims=True)
            p = jnp.exp(s - m)
            denom = jnp.sum(p, axis=-1, keepdims=True)
            p = p * pl.reciprocal(denom, approx=True)
            # Write this head's context directly into VMEM scratch at a
            # static lane offset (replaces jnp.concatenate).
            ctx_sc[:, hh * dh:(hh + 1) * dh] = jnp.dot(
                p.astype(jnp.bfloat16), v,
                preferred_element_type=jnp.float32)

        attn = (jnp.dot(ctx_sc[...].astype(jnp.bfloat16), wo_ref[0],
                        preferred_element_type=jnp.float32) + bo_ref[0])
        x = _layer_norm(attn + x, g1_ref[0], b1_ref[0], eps)

        # ---- feed-forward ---------------------------------------------------
        ffn = (jnp.dot(x.astype(jnp.bfloat16), wi_ref[0],
                       preferred_element_type=jnp.float32) + bi_ref[0])
        # tanh-approx GELU (EUP); exact-erf GELU would deviate slightly.
        ffn = jax.nn.gelu(ffn, approximate=True)
        ffn = (jnp.dot(ffn.astype(jnp.bfloat16), wf_ref[0],
                       preferred_element_type=jnp.float32) + bf_ref[0])
        x = _layer_norm(ffn + x, g2_ref[0], b2_ref[0], eps)

        x_ref[...] = x                                       # stay resident

        # ---- QA head, last layer only (VPU multiply + lane reduce) ---------
        @pl.when(l == nl - 1)
        def _():
            wqa = wqa_ref[...]                               # [2, H]
            bqa = bqa_ref[...]                               # [2, 1]
            sl_ref[...] = (jnp.sum(x * wqa[0:1, :], axis=-1, keepdims=True)
                           + bqa[0:1, :])                    # [S, 1]
            el_ref[...] = (jnp.sum(x * wqa[1:2, :], axis=-1, keepdims=True)
                           + bqa[1:2, :])                    # [S, 1]

    return kernel


def _encoder_call(params, cfg, emb_ln, mask_add, batch, seq):
    h = cfg.hidden_size
    inter = cfg.intermediate_size
    nl = cfg.num_layers
    n = batch * seq

    def per_batch(shape):          # 2-D arrays tiled along the batch axis
        return pl.BlockSpec(shape, lambda b, l: (b, 0))

    def per_batch3(shape):         # 3-D arrays tiled along the batch axis
        return pl.BlockSpec(shape, lambda b, l: (b, 0, 0))

    def per_layer(shape):          # stream layer l's weight slab
        return pl.BlockSpec(shape, lambda b, l: (l, 0, 0))

    def resident(shape):           # tiny constant-index params (QA head)
        return pl.BlockSpec(shape, lambda b, l: (0, 0))

    in_specs = [
        per_batch((seq, h)),                                  # emb (post-LN)
        per_batch3((1, 1, seq)),                              # additive mask
        per_layer((1, h, 3 * h)), per_layer((1, 1, 3 * h)),   # wqkv, bqkv
        per_layer((1, h, h)), per_layer((1, 1, h)),           # wo, bo
        per_layer((1, 1, h)), per_layer((1, 1, h)),           # attn LN g, b
        per_layer((1, h, inter)), per_layer((1, 1, inter)),   # wi, bi
        per_layer((1, inter, h)), per_layer((1, 1, h)),       # wf, bf
        per_layer((1, 1, h)), per_layer((1, 1, h)),           # ffn LN g, b
        resident((2, h)), resident((2, 1)),                   # QA head (wT, bT)
    ]
    inputs = [
        emb_ln, mask_add,
        params["wqkv"], params["bqkv"], params["wo"], params["bo"],
        params["ln1_g"], params["ln1_b"], params["wi"], params["bi"],
        params["wf"], params["bf"], params["ln2_g"], params["ln2_b"],
        params["wqa_t"], params["bqa_t"],
    ]
    out_shape = [
        jax.ShapeDtypeStruct((n, h), jnp.float32),   # final hidden states
        jax.ShapeDtypeStruct((n, 1), jnp.float32),   # start logits (column)
        jax.ShapeDtypeStruct((n, 1), jnp.float32),   # end logits (column)
    ]
    out_specs = [per_batch((seq, h)), per_batch((seq, 1)), per_batch((seq, 1))]

    kernel = _make_encoder_kernel(cfg, seq)
    return pl.pallas_call(
        kernel,
        grid=(batch, nl),
        in_specs=in_specs,
        out_specs=out_specs,
        out_shape=out_shape,
        scratch_shapes=[pltpu.VMEM((seq, h), jnp.float32)],   # ctx scratch
        compiler_params=pltpu.CompilerParams(
            dimension_semantics=("parallel", "arbitrary"),
            vmem_limit_bytes=32 * 1024 * 1024),
    )(*inputs)


# ----------------------------------------------------------------------------
# Mini-BERT parameter construction (deterministic, synthetic)
# ----------------------------------------------------------------------------

class Config:
    vocab_size = 100
    type_vocab_size = 2
    max_position_embeddings = 64
    hidden_size = 32
    num_heads = 2
    num_layers = 2
    intermediate_size = 64
    layer_norm_eps = 1e-12


def init_params(key, cfg):
    std = 0.02
    h, i, nl = cfg.hidden_size, cfg.intermediate_size, cfg.num_layers
    dh = h // cfg.num_heads
    keys = iter(jax.random.split(key, 16))

    def w(shape, dtype=jnp.bfloat16):
        return (jax.random.normal(next(keys), shape, jnp.float32)
                * std).astype(dtype)

    # Fold 1/sqrt(dh) into the Q columns of the fused QKV weight (and its
    # bias, which is zero here) so the kernel never scales the score matrix.
    wqkv = jax.random.normal(next(keys), (nl, h, 3 * h), jnp.float32) * std
    wqkv = wqkv.at[:, :, :h].multiply(1.0 / math.sqrt(dh))

    return {
        "word_emb": w((cfg.vocab_size, h), jnp.float32),
        "pos_emb": w((cfg.max_position_embeddings, h), jnp.float32),
        "type_emb": w((cfg.type_vocab_size, h), jnp.float32),
        "emb_ln_g": jnp.ones((h,), jnp.float32),
        "emb_ln_b": jnp.zeros((h,), jnp.float32),
        # per-layer weights stacked along a leading L axis; matmul weights in
        # bf16 (MXU operands), biases / LN params in f32 (VPU epilogue).
        "wqkv": wqkv.astype(jnp.bfloat16),
        "bqkv": jnp.zeros((nl, 1, 3 * h), jnp.float32),
        "wo": w((nl, h, h)),
        "bo": jnp.zeros((nl, 1, h), jnp.float32),
        "ln1_g": jnp.ones((nl, 1, h), jnp.float32),
        "ln1_b": jnp.zeros((nl, 1, h), jnp.float32),
        "wi": w((nl, h, i)),
        "bi": jnp.zeros((nl, 1, i), jnp.float32),
        "wf": w((nl, i, h)),
        "bf": jnp.zeros((nl, 1, h), jnp.float32),
        "ln2_g": jnp.ones((nl, 1, h), jnp.float32),
        "ln2_b": jnp.zeros((nl, 1, h), jnp.float32),
        # QA head stored transposed ([2, H] / [2, 1]) so it is applied with a
        # VPU multiply + lane reduce inside the kernel.
        "wqa_t": w((2, h), jnp.float32),
        "bqa_t": jnp.zeros((2, 1), jnp.float32),
    }


# ----------------------------------------------------------------------------
# Loss (PyTorch CrossEntropyLoss semantics, ignore_index = src_len)
# ----------------------------------------------------------------------------

def _cross_entropy(logits, positions, ignored_index):
    """logits: [B, S] f32, positions: [B] int32. Mean over non-ignored."""
    pos = jnp.clip(positions, 0, ignored_index)
    m = jnp.max(logits, axis=-1, keepdims=True)
    lse = m[:, 0] + jnp.log(jnp.sum(jnp.exp(logits - m), axis=-1))
    safe_idx = jnp.minimum(pos, ignored_index - 1)
    picked = jnp.take_along_axis(logits, safe_idx[:, None], axis=-1)[:, 0]
    valid = (pos != ignored_index).astype(jnp.float32)
    # NaN if every target is ignored — same as PyTorch.
    return jnp.sum((lse - picked) * valid) / jnp.sum(valid)


# ----------------------------------------------------------------------------
# BertQA forward
# ----------------------------------------------------------------------------

@functools.partial(jax.jit, static_argnums=(1,))
def bert_qa_forward(params, cfg, input_ids, attention_mask=None,
                    token_type_ids=None, position_ids=None,
                    start_positions=None, end_positions=None):
    # PyTorch convention: input_ids / token_type_ids are [src_len, batch].
    src_len, batch = input_ids.shape
    h = cfg.hidden_size
    n = batch * src_len

    ids_bs = input_ids.T                                   # [B, S]
    if token_type_ids is None:
        token_type_ids = jnp.zeros_like(input_ids)
    types_bs = token_type_ids.T                            # [B, S]
    if position_ids is None:
        position_ids = jnp.arange(src_len, dtype=jnp.int32)
    if attention_mask is None:
        attention_mask = jnp.ones((batch, src_len), jnp.float32)

    # TODO(synk): embedding-table gather (data-dependent lookup) stays in XLA
    # glue; a DMA-gather Pallas kernel is not worth it at these sizes.
    emb = (jnp.take(params["word_emb"], ids_bs, axis=0)
           + jnp.take(params["pos_emb"], position_ids, axis=0)[None, :, :]
           + jnp.take(params["type_emb"], types_bs, axis=0))   # [B, S, H]
    emb = emb.reshape(n, h).astype(jnp.float32)
    # Embedding LayerNorm in the wrapper (one-shot elementwise; frees a
    # resident [N, H] VMEM buffer + the layer-0-only kernel branch).
    emb = _layer_norm(emb, params["emb_ln_g"], params["emb_ln_b"],
                      cfg.layer_norm_eps)

    # Per-batch additive key mask [B, 1, S] (no O(N^2) block-diagonal mask).
    mask_add = ((1.0 - attention_mask.astype(jnp.float32)) * -10000.0
                ).reshape(batch, 1, src_len)

    x_out, start_col, end_col = _encoder_call(params, cfg, emb, mask_add,
                                              batch, src_len)

    sequence_output = x_out.reshape(batch, src_len, h).transpose(1, 0, 2)
    start_logits = start_col.reshape(batch, src_len)
    end_logits = end_col.reshape(batch, src_len)

    if start_positions is not None and end_positions is not None:
        # Trivial [B, S] reduction kept in the XLA wrapper so the kernel's
        # batch grid axis can stay "parallel" (review item 12).
        ignored_index = src_len  # matches PyTorch: start_logits.size(1)
        start_loss = _cross_entropy(start_logits,
                                    start_positions.astype(jnp.int32),
                                    ignored_index)
        end_loss = _cross_entropy(end_logits,
                                  end_positions.astype(jnp.int32),
                                  ignored_index)
        return 0.5 * (start_loss + end_loss), start_logits, end_logits
    return sequence_output, start_logits, end_logits


# ----------------------------------------------------------------------------
# Demo
# ----------------------------------------------------------------------------

if __name__ == "__main__":
    cfg = Config()
    src_len, batch = 8, 2

    key = jax.random.PRNGKey(0)
    k_param, k_ids, k_types, k_sp, k_ep = jax.random.split(key, 5)

    params = init_params(k_param, cfg)

    input_ids = jax.random.randint(k_ids, (src_len, batch), 0, cfg.vocab_size,
                                   dtype=jnp.int32)
    token_type_ids = jax.random.randint(k_types, (src_len, batch), 0, 2,
                                        dtype=jnp.int32)
    attention_mask = jnp.ones((batch, src_len), jnp.float32)
    start_positions = jax.random.randint(k_sp, (batch,), 0, src_len,
                                         dtype=jnp.int32)
    end_positions = jax.random.randint(k_ep, (batch,), 0, src_len,
                                       dtype=jnp.int32)

    # Inference branch: returns sequence_output + logits.
    seq_out, start_logits, end_logits = bert_qa_forward(
        params, cfg, input_ids, attention_mask, token_type_ids)
    jax.block_until_ready((seq_out, start_logits, end_logits))
    assert seq_out.shape == (src_len, batch, cfg.hidden_size)
    assert start_logits.shape == (batch, src_len)
    assert end_logits.shape == (batch, src_len)

    # Training branch: returns (loss, start_logits, end_logits).
    loss, sl, el = bert_qa_forward(
        params, cfg, input_ids, attention_mask, token_type_ids,
        start_positions=start_positions, end_positions=end_positions)
    jax.block_until_ready((loss, sl, el))
    assert loss.shape == ()
    assert bool(jnp.isfinite(loss))

    print("KERNEL_OK")
</pallas_src>

<mosaic_0001>
module attributes {stable_mosaic.version = 11 : i64} {
  func.func @kernel(%arg0: i32, %arg1: i32, %arg2: memref<8x32xf32, #tpu.memory_space<vmem>>, %arg3: memref<1x1x8xf32, #tpu.memory_space<vmem>>, %arg4: memref<1x32x96xbf16, #tpu.memory_space<vmem>>, %arg5: memref<1x1x96xf32, #tpu.memory_space<vmem>>, %arg6: memref<1x32x32xbf16, #tpu.memory_space<vmem>>, %arg7: memref<1x1x32xf32, #tpu.memory_space<vmem>>, %arg8: memref<1x1x32xf32, #tpu.memory_space<vmem>>, %arg9: memref<1x1x32xf32, #tpu.memory_space<vmem>>, %arg10: memref<1x32x64xbf16, #tpu.memory_space<vmem>>, %arg11: memref<1x1x64xf32, #tpu.memory_space<vmem>>, %arg12: memref<1x64x32xbf16, #tpu.memory_space<vmem>>, %arg13: memref<1x1x32xf32, #tpu.memory_space<vmem>>, %arg14: memref<1x1x32xf32, #tpu.memory_space<vmem>>, %arg15: memref<1x1x32xf32, #tpu.memory_space<vmem>>, %arg16: memref<2x32xf32, #tpu.memory_space<vmem>>, %arg17: memref<2x1xf32, #tpu.memory_space<vmem>>, %arg18: memref<8x32xf32, #tpu.memory_space<vmem>>, %arg19: memref<8x1xf32, #tpu.memory_space<vmem>>, %arg20: memref<8x1xf32, #tpu.memory_space<vmem>>, %arg21: memref<8x32xf32, #tpu.memory_space<vmem>>) attributes {dimension_semantics = [#tpu.dimension_semantics<parallel>, #tpu.dimension_semantics<arbitrary>], iteration_bounds = array<i64: 2, 2>, scalar_prefetch = 0 : i64, scratch_operands = 1 : i64, tpu.core_type = #tpu.core_type<tc>, window_params = [{transform_indices = @transform_0, window_bounds = array<i64: 8, 32>}, {transform_indices = @transform_1, window_bounds = array<i64: 1, 1, 8>}, {transform_indices = @transform_2, window_bounds = array<i64: 1, 32, 96>}, {transform_indices = @transform_3, window_bounds = array<i64: 1, 1, 96>}, {transform_indices = @transform_4, window_bounds = array<i64: 1, 32, 32>}, {transform_indices = @transform_5, window_bounds = array<i64: 1, 1, 32>}, {transform_indices = @transform_6, window_bounds = array<i64: 1, 1, 32>}, {transform_indices = @transform_7, window_bounds = array<i64: 1, 1, 32>}, {transform_indices = @transform_8, window_bounds = array<i64: 1, 32, 64>}, {transform_indices = @transform_9, window_bounds = array<i64: 1, 1, 64>}, {transform_indices = @transform_10, window_bounds = array<i64: 1, 64, 32>}, {transform_indices = @transform_11, window_bounds = array<i64: 1, 1, 32>}, {transform_indices = @transform_12, window_bounds = array<i64: 1, 1, 32>}, {transform_indices = @transform_13, window_bounds = array<i64: 1, 1, 32>}, {pipeline_mode = #tpu.pipeline_mode<synchronous>, transform_indices = @transform_14, window_bounds = array<i64: 2, 32>}, {pipeline_mode = #tpu.pipeline_mode<synchronous>, transform_indices = @transform_15, window_bounds = array<i64: 2, 1>}, {transform_indices = @transform_16, window_bounds = array<i64: 8, 32>}, {transform_indices = @transform_17, window_bounds = array<i64: 8, 1>}, {transform_indices = @transform_18, window_bounds = array<i64: 8, 1>}]} {
    %c0_i32 = arith.constant 0 : i32
    %0 = arith.cmpi eq, %arg1, %c0_i32 : i32
    %1 = arith.extui %0 : i1 to i32
    %c0_i32_0 = arith.constant 0 : i32
    %2 = arith.cmpi ne, %1, %c0_i32_0 : i32
    scf.if %2 {
      %c0_74 = arith.constant 0 : index
      %c0_75 = arith.constant 0 : index
      %154 = vector.load %arg2[%c0_74, %c0_75] : memref<8x32xf32, #tpu.memory_space<vmem>>, vector<8x32xf32>
      %c0_76 = arith.constant 0 : index
      %c0_77 = arith.constant 0 : index
      %155 = vector.load %arg18[%c0_76, %c0_77] : memref<8x32xf32, #tpu.memory_space<vmem>>, vector<8x32xf32>
      tpu.vector_store %arg18[%c0_76, %c0_77], %154 {strides = array<i32>} : memref<8x32xf32, #tpu.memory_space<vmem>>, vector<8x32xf32>,
    } else {
    }
    %c0 = arith.constant 0 : index
    %c0_1 = arith.constant 0 : index
    %3 = vector.load %arg18[%c0, %c0_1] : memref<8x32xf32, #tpu.memory_space<vmem>>, vector<8x32xf32>
    %4 = arith.truncf %3 : vector<8x32xf32> to vector<8x32xbf16>
    %c0_2 = arith.constant 0 : index
    %c0_3 = arith.constant 0 : index
    %c0_4 = arith.constant 0 : index
    %5 = vector.load %arg4[%c0_2, %c0_3, %c0_4] : memref<1x32x96xbf16, #tpu.memory_space<vmem>>, vector<1x32x96xbf16>
    %6 = vector.shape_cast %5 : vector<1x32x96xbf16> to vector<32x96xbf16>
    %cst = arith.constant dense<0.000000e+00> : vector<8x96xf32>
    %7 = tpu.matmul %4, %6, %cst {dimension_numbers = #tpu.dot_dimension_numbers<[1], [0], [0], [1], [0, 0, 1, 1], [], []>} : vector<8x32xbf16>, vector<32x96xbf16>, vector<8x96xf32> -> vector<8x96xf32>
    %c0_5 = arith.constant 0 : index
    %c0_6 = arith.constant 0 : index
    %c0_7 = arith.constant 0 : index
    %8 = vector.load %arg5[%c0_5, %c0_6, %c0_7] : memref<1x1x96xf32, #tpu.memory_space<vmem>>, vector<1x1x96xf32>
    %9 = vector.shape_cast %8 : vector<1x1x96xf32> to vector<1x96xf32>
    %10 = vector.broadcast %9 : vector<1x96xf32> to vector<8x96xf32>
    %11 = arith.addf %7, %10 : vector<8x96xf32>
    %c0_8 = arith.constant 0 : index
    %c0_9 = arith.constant 0 : index
    %c0_10 = arith.constant 0 : index
    %12 = vector.load %arg3[%c0_8, %c0_9, %c0_10] : memref<1x1x8xf32, #tpu.memory_space<vmem>>, vector<1x1x8xf32>
    %13 = vector.shape_cast %12 : vector<1x1x8xf32> to vector<1x8xf32>
    %14 = vector.extract_strided_slice %11 {offsets = [0, 0], sizes = [8, 16], strides = [1, 1]} : vector<8x96xf32> to vector<8x16xf32>
    %15 = arith.truncf %14 : vector<8x16xf32> to vector<8x16xbf16>
    %16 = vector.extract_strided_slice %11 {offsets = [0, 32], sizes = [8, 16], strides = [1, 1]} : vector<8x96xf32> to vector<8x16xf32>
    %17 = arith.truncf %16 : vector<8x16xf32> to vector<8x16xbf16>
    %18 = vector.extract_strided_slice %11 {offsets = [0, 64], sizes = [8, 16], strides = [1, 1]} : vector<8x96xf32> to vector<8x16xf32>
    %19 = arith.truncf %18 : vector<8x16xf32> to vector<8x16xbf16>
    %cst_11 = arith.constant dense<0.000000e+00> : vector<8x8xf32>
    %20 = tpu.matmul %15, %17, %cst_11 {dimension_numbers = #tpu.dot_dimension_numbers<[1], [1], [0], [0], [0, 0, 1, 0], [], []>} : vector<8x16xbf16>, vector<8x16xbf16>, vector<8x8xf32> -> vector<8x8xf32>
    %21 = vector.broadcast %13 : vector<1x8xf32> to vector<8x8xf32>
    %22 = arith.addf %20, %21 : vector<8x8xf32>
    %cst_12 = arith.constant dense<0xFF800000> : vector<8xf32>
    %23 = vector.multi_reduction <maximumf>, %22, %cst_12 [1] : vector<8x8xf32> to vector<8xf32>
    %24 = vector.shape_cast %23 : vector<8xf32> to vector<8x1xf32>
    %25 = vector.broadcast %24 : vector<8x1xf32> to vector<8x8xf32>
    %26 = arith.subf %22, %25 : vector<8x8xf32>
    %27 = math.exp %26 : vector<8x8xf32>
    %cst_13 = arith.constant dense<0.000000e+00> : vector<8xf32>
    %28 = vector.multi_reduction <add>, %27, %cst_13 [1] : vector<8x8xf32> to vector<8xf32>
    %29 = vector.shape_cast %28 : vector<8xf32> to vector<8x1xf32>
    %30 = tpu.reciprocal %29 {approx = true} : vector<8x1xf32> -> vector<8x1xf32>
    %31 = vector.broadcast %30 : vector<8x1xf32> to vector<8x8xf32>
    %32 = arith.mulf %27, %31 : vector<8x8xf32>
    %33 = arith.truncf %32 : vector<8x8xf32> to vector<8x8xbf16>
    %cst_14 = arith.constant dense<0.000000e+00> : vector<8x16xf32>
    %34 = tpu.matmul %33, %19, %cst_14 {dimension_numbers = #tpu.dot_dimension_numbers<[1], [0], [0], [1], [0, 0, 1, 1], [], []>} : vector<8x8xbf16>, vector<8x16xbf16>, vector<8x16xf32> -> vector<8x16xf32>
    %c0_15 = arith.constant 0 : index
    %c0_16 = arith.constant 0 : index
    %35 = vector.load %arg21[%c0_15, %c0_16] : memref<8x32xf32, #tpu.memory_space<vmem>>, vector<8x16xf32>
    tpu.vector_store %arg21[%c0_15, %c0_16], %34 {strides = array<i32>} : memref<8x32xf32, #tpu.memory_space<vmem>>, vector<8x16xf32>,
    %36 = vector.extract_strided_slice %11 {offsets = [0, 16], sizes = [8, 16], strides = [1, 1]} : vector<8x96xf32> to vector<8x16xf32>
    %37 = arith.truncf %36 : vector<8x16xf32> to vector<8x16xbf16>
    %38 = vector.extract_strided_slice %11 {offsets = [0, 48], sizes = [8, 16], strides = [1, 1]} : vector<8x96xf32> to vector<8x16xf32>
    %39 = arith.truncf %38 : vector<8x16xf32> to vector<8x16xbf16>
    %40 = vector.extract_strided_slice %11 {offsets = [0, 80], sizes = [8, 16], strides = [1, 1]} : vector<8x96xf32> to vector<8x16xf32>
    %41 = arith.truncf %40 : vector<8x16xf32> to vector<8x16xbf16>
    %cst_17 = arith.constant dense<0.000000e+00> : vector<8x8xf32>
    %42 = tpu.matmul %37, %39, %cst_17 {dimension_numbers = #tpu.dot_dimension_numbers<[1], [1], [0], [0], [0, 0, 1, 0], [], []>} : vector<8x16xbf16>, vector<8x16xbf16>, vector<8x8xf32> -> vector<8x8xf32>
    %43 = vector.broadcast %13 : vector<1x8xf32> to vector<8x8xf32>
    %44 = arith.addf %42, %43 : vector<8x8xf32>
    %cst_18 = arith.constant dense<0xFF800000> : vector<8xf32>
    %45 = vector.multi_reduction <maximumf>, %44, %cst_18 [1] : vector<8x8xf32> to vector<8xf32>
    %46 = vector.shape_cast %45 : vector<8xf32> to vector<8x1xf32>
    %47 = vector.broadcast %46 : vector<8x1xf32> to vector<8x8xf32>
    %48 = arith.subf %44, %47 : vector<8x8xf32>
    %49 = math.exp %48 : vector<8x8xf32>
    %cst_19 = arith.constant dense<0.000000e+00> : vector<8xf32>
    %50 = vector.multi_reduction <add>, %49, %cst_19 [1] : vector<8x8xf32> to vector<8xf32>
    %51 = vector.shape_cast %50 : vector<8xf32> to vector<8x1xf32>
    %52 = tpu.reciprocal %51 {approx = true} : vector<8x1xf32> -> vector<8x1xf32>
    %53 = vector.broadcast %52 : vector<8x1xf32> to vector<8x8xf32>
    %54 = arith.mulf %49, %53 : vector<8x8xf32>
    %55 = arith.truncf %54 : vector<8x8xf32> to vector<8x8xbf16>
    %cst_20 = arith.constant dense<0.000000e+00> : vector<8x16xf32>
    %56 = tpu.matmul %55, %41, %cst_20 {dimension_numbers = #tpu.dot_dimension_numbers<[1], [0], [0], [1], [0, 0, 1, 1], [], []>} : vector<8x8xbf16>, vector<8x16xbf16>, vector<8x16xf32> -> vector<8x16xf32>
    %c0_21 = arith.constant 0 : index
    %c16 = arith.constant 16 : index
    %57 = vector.load %arg21[%c0_21, %c16] : memref<8x32xf32, #tpu.memory_space<vmem>>, vector<8x16xf32>
    tpu.vector_store %arg21[%c0_21, %c16], %56 {strides = array<i32>} : memref<8x32xf32, #tpu.memory_space<vmem>>, vector<8x16xf32>,
    %c0_22 = arith.constant 0 : index
    %c0_23 = arith.constant 0 : index
    %58 = vector.load %arg21[%c0_22, %c0_23] : memref<8x32xf32, #tpu.memory_space<vmem>>, vector<8x32xf32>
    %59 = arith.truncf %58 : vector<8x32xf32> to vector<8x32xbf16>
    %c0_24 = arith.constant 0 : index
    %c0_25 = arith.constant 0 : index
    %c0_26 = arith.constant 0 : index
    %60 = vector.load %arg6[%c0_24, %c0_25, %c0_26] : memref<1x32x32xbf16, #tpu.memory_space<vmem>>, vector<1x32x32xbf16>
    %61 = vector.shape_cast %60 : vector<1x32x32xbf16> to vector<32x32xbf16>
    %cst_27 = arith.constant dense<0.000000e+00> : vector<8x32xf32>
    %62 = tpu.matmul %59, %61, %cst_27 {dimension_numbers = #tpu.dot_dimension_numbers<[1], [0], [0], [1], [0, 0, 1, 1], [], []>} : vector<8x32xbf16>, vector<32x32xbf16>, vector<8x32xf32> -> vector<8x32xf32>
    %c0_28 = arith.constant 0 : index
    %c0_29 = arith.constant 0 : index
    %c0_30 = arith.constant 0 : index
    %63 = vector.load %arg7[%c0_28, %c0_29, %c0_30] : memref<1x1x32xf32, #tpu.memory_space<vmem>>, vector<1x1x32xf32>
    %64 = vector.shape_cast %63 : vector<1x1x32xf32> to vector<1x32xf32>
    %65 = vector.broadcast %64 : vector<1x32xf32> to vector<8x32xf32>
    %66 = arith.addf %62, %65 : vector<8x32xf32>
    %67 = arith.addf %66, %3 : vector<8x32xf32>
    %c0_31 = arith.constant 0 : index
    %c0_32 = arith.constant 0 : index
    %c0_33 = arith.constant 0 : index
    %68 = vector.load %arg8[%c0_31, %c0_32, %c0_33] : memref<1x1x32xf32, #tpu.memory_space<vmem>>, vector<1x1x32xf32>
    %69 = vector.shape_cast %68 : vector<1x1x32xf32> to vector<1x32xf32>
    %c0_34 = arith.constant 0 : index
    %c0_35 = arith.constant 0 : index
    %c0_36 = arith.constant 0 : index
    %70 = vector.load %arg9[%c0_34, %c0_35, %c0_36] : memref<1x1x32xf32, #tpu.memory_space<vmem>>, vector<1x1x32xf32>
    %71 = vector.shape_cast %70 : vector<1x1x32xf32> to vector<1x32xf32>
    %cst_37 = arith.constant dense<0.000000e+00> : vector<8xf32>
    %72 = vector.multi_reduction <add>, %67, %cst_37 [1] : vector<8x32xf32> to vector<8xf32>
    %73 = vector.shape_cast %72 : vector<8xf32> to vector<8x1xf32>
    %cst_38 = arith.constant 3.200000e+01 : f32
    %74 = vector.broadcast %cst_38 : f32 to vector<8x1xf32>
    %75 = arith.divf %73, %74 : vector<8x1xf32>
    %76 = vector.broadcast %75 : vector<8x1xf32> to vector<8x32xf32>
    %77 = arith.subf %67, %76 : vector<8x32xf32>
    %78 = arith.mulf %77, %77 : vector<8x32xf32>
    %cst_39 = arith.constant dense<0.000000e+00> : vector<8xf32>
    %79 = vector.multi_reduction <add>, %78, %cst_39 [1] : vector<8x32xf32> to vector<8xf32>
    %80 = vector.shape_cast %79 : vector<8xf32> to vector<8x1xf32>
    %cst_40 = arith.constant 3.200000e+01 : f32
    %81 = vector.broadcast %cst_40 : f32 to vector<8x1xf32>
    %82 = arith.divf %80, %81 : vector<8x1xf32>
    %83 = vector.broadcast %75 : vector<8x1xf32> to vector<8x32xf32>
    %84 = arith.subf %67, %83 : vector<8x32xf32>
    %cst_41 = arith.constant 9.99999996E-13 : f32
    %85 = vector.broadcast %cst_41 : f32 to vector<8x1xf32>
    %86 = arith.addf %82, %85 : vector<8x1xf32>
    %87 = math.rsqrt %86 : vector<8x1xf32>
    %88 = vector.broadcast %87 : vector<8x1xf32> to vector<8x32xf32>
    %89 = arith.mulf %84, %88 : vector<8x32xf32>
    %90 = vector.broadcast %69 : vector<1x32xf32> to vector<8x32xf32>
    %91 = arith.mulf %89, %90 : vector<8x32xf32>
    %92 = vector.broadcast %71 : vector<1x32xf32> to vector<8x32xf32>
    %93 = arith.addf %91, %92 : vector<8x32xf32>
    %94 = arith.truncf %93 : vector<8x32xf32> to vector<8x32xbf16>
    %c0_42 = arith.constant 0 : index
    %c0_43 = arith.constant 0 : index
    %c0_44 = arith.constant 0 : index
    %95 = vector.load %arg10[%c0_42, %c0_43, %c0_44] : memref<1x32x64xbf16, #tpu.memory_space<vmem>>, vector<1x32x64xbf16>
    %96 = vector.shape_cast %95 : vector<1x32x64xbf16> to vector<32x64xbf16>
    %cst_45 = arith.constant dense<0.000000e+00> : vector<8x64xf32>
    %97 = tpu.matmul %94, %96, %cst_45 {dimension_numbers = #tpu.dot_dimension_numbers<[1], [0], [0], [1], [0, 0, 1, 1], [], []>} : vector<8x32xbf16>, vector<32x64xbf16>, vector<8x64xf32> -> vector<8x64xf32>
    %c0_46 = arith.constant 0 : index
    %c0_47 = arith.constant 0 : index
    %c0_48 = arith.constant 0 : index
    %98 = vector.load %arg11[%c0_46, %c0_47, %c0_48] : memref<1x1x64xf32, #tpu.memory_space<vmem>>, vector<1x1x64xf32>
    %99 = vector.shape_cast %98 : vector<1x1x64xf32> to vector<1x64xf32>
    %100 = vector.broadcast %99 : vector<1x64xf32> to vector<8x64xf32>
    %101 = arith.addf %97, %100 : vector<8x64xf32>
    %102 = arith.mulf %101, %101 : vector<8x64xf32>
    %103 = arith.mulf %101, %102 : vector<8x64xf32>
    %cst_49 = arith.constant 4.471500e-02 : f32
    %104 = vector.broadcast %cst_49 : f32 to vector<8x64xf32>
    %105 = arith.mulf %104, %103 : vector<8x64xf32>
    %106 = arith.addf %101, %105 : vector<8x64xf32>
    %cst_50 = arith.constant 0.797884583 : f32
    %107 = vector.broadcast %cst_50 : f32 to vector<8x64xf32>
    %108 = arith.mulf %107, %106 : vector<8x64xf32>
    %109 = math.tanh %108 : vector<8x64xf32>
    %cst_51 = arith.constant 1.000000e+00 : f32
    %110 = vector.broadcast %cst_51 : f32 to vector<8x64xf32>
    %111 = arith.addf %110, %109 : vector<8x64xf32>
    %cst_52 = arith.constant 5.000000e-01 : f32
    %112 = vector.broadcast %cst_52 : f32 to vector<8x64xf32>
    %113 = arith.mulf %112, %111 : vector<8x64xf32>
    %114 = arith.mulf %101, %113 : vector<8x64xf32>
    %115 = arith.truncf %114 : vector<8x64xf32> to vector<8x64xbf16>
    %c0_53 = arith.constant 0 : index
    %c0_54 = arith.constant 0 : index
    %c0_55 = arith.constant 0 : index
    %116 = vector.load %arg12[%c0_53, %c0_54, %c0_55] : memref<1x64x32xbf16, #tpu.memory_space<vmem>>, vector<1x64x32xbf16>
    %117 = vector.shape_cast %116 : vector<1x64x32xbf16> to vector<64x32xbf16>
    %cst_56 = arith.constant dense<0.000000e+00> : vector<8x32xf32>
    %118 = tpu.matmul %115, %117, %cst_56 {dimension_numbers = #tpu.dot_dimension_numbers<[1], [0], [0], [1], [0, 0, 1, 1], [], []>} : vector<8x64xbf16>, vector<64x32xbf16>, vector<8x32xf32> -> vector<8x32xf32>
    %c0_57 = arith.constant 0 : index
    %c0_58 = arith.constant 0 : index
    %c0_59 = arith.constant 0 : index
    %119 = vector.load %arg13[%c0_57, %c0_58, %c0_59] : memref<1x1x32xf32, #tpu.memory_space<vmem>>, vector<1x1x32xf32>
    %120 = vector.shape_cast %119 : vector<1x1x32xf32> to vector<1x32xf32>
    %121 = vector.broadcast %120 : vector<1x32xf32> to vector<8x32xf32>
    %122 = arith.addf %118, %121 : vector<8x32xf32>
    %123 = arith.addf %122, %93 : vector<8x32xf32>
    %c0_60 = arith.constant 0 : index
    %c0_61 = arith.constant 0 : index
    %c0_62 = arith.constant 0 : index
    %124 = vector.load %arg14[%c0_60, %c0_61, %c0_62] : memref<1x1x32xf32, #tpu.memory_space<vmem>>, vector<1x1x32xf32>
    %125 = vector.shape_cast %124 : vector<1x1x32xf32> to vector<1x32xf32>
    %c0_63 = arith.constant 0 : index
    %c0_64 = arith.constant 0 : index
    %c0_65 = arith.constant 0 : index
    %126 = vector.load %arg15[%c0_63, %c0_64, %c0_65] : memref<1x1x32xf32, #tpu.memory_space<vmem>>, vector<1x1x32xf32>
    %127 = vector.shape_cast %126 : vector<1x1x32xf32> to vector<1x32xf32>
    %cst_66 = arith.constant dense<0.000000e+00> : vector<8xf32>
    %128 = vector.multi_reduction <add>, %123, %cst_66 [1] : vector<8x32xf32> to vector<8xf32>
    %129 = vector.shape_cast %128 : vector<8xf32> to vector<8x1xf32>
    %cst_67 = arith.constant 3.200000e+01 : f32
    %130 = vector.broadcast %cst_67 : f32 to vector<8x1xf32>
    %131 = arith.divf %129, %130 : vector<8x1xf32>
    %132 = vector.broadcast %131 : vector<8x1xf32> to vector<8x32xf32>
    %133 = arith.subf %123, %132 : vector<8x32xf32>
    %134 = arith.mulf %133, %133 : vector<8x32xf32>
    %cst_68 = arith.constant dense<0.000000e+00> : vector<8xf32>
    %135 = vector.multi_reduction <add>, %134, %cst_68 [1] : vector<8x32xf32> to vector<8xf32>
    %136 = vector.shape_cast %135 : vector<8xf32> to vector<8x1xf32>
    %cst_69 = arith.constant 3.200000e+01 : f32
    %137 = vector.broadcast %cst_69 : f32 to vector<8x1xf32>
    %138 = arith.divf %136, %137 : vector<8x1xf32>
    %139 = vector.broadcast %131 : vector<8x1xf32> to vector<8x32xf32>
    %140 = arith.subf %123, %139 : vector<8x32xf32>
    %cst_70 = arith.constant 9.99999996E-13 : f32
    %141 = vector.broadcast %cst_70 : f32 to vector<8x1xf32>
    %142 = arith.addf %138, %141 : vector<8x1xf32>
    %143 = math.rsqrt %142 : vector<8x1xf32>
    %144 = vector.broadcast %143 : vector<8x1xf32> to vector<8x32xf32>
    %145 = arith.mulf %140, %144 : vector<8x32xf32>
    %146 = vector.broadcast %125 : vector<1x32xf32> to vector<8x32xf32>
    %147 = arith.mulf %145, %146 : vector<8x32xf32>
    %148 = vector.broadcast %127 : vector<1x32xf32> to vector<8x32xf32>
    %149 = arith.addf %147, %148 : vector<8x32xf32>
    %c0_71 = arith.constant 0 : index
    %c0_72 = arith.constant 0 : index
    %150 = vector.load %arg18[%c0_71, %c0_72] : memref<8x32xf32, #tpu.memory_space<vmem>>, vector<8x32xf32>
    tpu.vector_store %arg18[%c0_71, %c0_72], %149 {strides = array<i32>} : memref<8x32xf32, #tpu.memory_space<vmem>>, vector<8x32xf32>,
    %c1_i32 = arith.constant 1 : i32
    %151 = arith.cmpi eq, %arg1, %c1_i32 : i32
    %152 = arith.extui %151 : i1 to i32
    %c0_i32_73 = arith.constant 0 : i32
    %153 = arith.cmpi ne, %152, %c0_i32_73 : i32
    scf.if %153 {
      %c0_74 = arith.constant 0 : index
      %c0_75 = arith.constant 0 : index
      %154 = vector.load %arg16[%c0_74, %c0_75] : memref<2x32xf32, #tpu.memory_space<vmem>>, vector<2x32xf32>
      %c0_76 = arith.constant 0 : index
      %c0_77 = arith.constant 0 : index
      %155 = vector.load %arg17[%c0_76, %c0_77] : memref<2x1xf32, #tpu.memory_space<vmem>>, vector<2x1xf32>
      %156 = vector.extract_strided_slice %154 {offsets = [0, 0], sizes = [1, 32], strides = [1, 1]} : vector<2x32xf32> to vector<1x32xf32>
      %157 = vector.broadcast %156 : vector<1x32xf32> to vector<8x32xf32>
      %158 = arith.mulf %149, %157 : vector<8x32xf32>
      %cst_78 = arith.constant dense<0.000000e+00> : vector<8xf32>
      %159 = vector.multi_reduction <add>, %158, %cst_78 [1] : vector<8x32xf32> to vector<8xf32>
      %160 = vector.shape_cast %159 : vector<8xf32> to vector<8x1xf32>
      %161 = vector.extract_strided_slice %155 {offsets = [0, 0], sizes = [1, 1], strides = [1, 1]} : vector<2x1xf32> to vector<1x1xf32>
      %162 = vector.broadcast %161 : vector<1x1xf32> to vector<8x1xf32>
      %163 = arith.addf %160, %162 : vector<8x1xf32>
      %c0_79 = arith.constant 0 : index
      %c0_80 = arith.constant 0 : index
      %164 = vector.load %arg19[%c0_79, %c0_80] : memref<8x1xf32, #tpu.memory_space<vmem>>, vector<8x1xf32>
      tpu.vector_store %arg19[%c0_79, %c0_80], %163 {strides = array<i32>} : memref<8x1xf32, #tpu.memory_space<vmem>>, vector<8x1xf32>,
      %165 = vector.extract_strided_slice %154 {offsets = [1, 0], sizes = [1, 32], strides = [1, 1]} : vector<2x32xf32> to vector<1x32xf32>
      %166 = vector.broadcast %165 : vector<1x32xf32> to vector<8x32xf32>
      %167 = arith.mulf %149, %166 : vector<8x32xf32>
      %cst_81 = arith.constant dense<0.000000e+00> : vector<8xf32>
      %168 = vector.multi_reduction <add>, %167, %cst_81 [1] : vector<8x32xf32> to vector<8xf32>
      %169 = vector.shape_cast %168 : vector<8xf32> to vector<8x1xf32>
      %170 = vector.extract_strided_slice %155 {offsets = [1, 0], sizes = [1, 1], strides = [1, 1]} : vector<2x1xf32> to vector<1x1xf32>
      %171 = vector.broadcast %170 : vector<1x1xf32> to vector<8x1xf32>
      %172 = arith.addf %169, %171 : vector<8x1xf32>
      %c0_82 = arith.constant 0 : index
      %c0_83 = arith.constant 0 : index
      %173 = vector.load %arg20[%c0_82, %c0_83] : memref<8x1xf32, #tpu.memory_space<vmem>>, vector<8x1xf32>
      tpu.vector_store %arg20[%c0_82, %c0_83], %172 {strides = array<i32>} : memref<8x1xf32, #tpu.memory_space<vmem>>, vector<8x1xf32>,
    } else {
    }
    return
  }
  func.func @transform_0(%arg0: i32, %arg1: i32) -> (i32, i32) {
    %c0_i32 = arith.constant 0 : i32
    %c0_i32_0 = arith.constant 0 : i32
    return %arg0, %c0_i32 : i32, i32
  }
  func.func @transform_1(%arg0: i32, %arg1: i32) -> (i32, i32, i32) {
    %c0_i32 = arith.constant 0 : i32
    %c0_i32_0 = arith.constant 0 : i32
    %c0_i32_1 = arith.constant 0 : i32
    return %arg0, %c0_i32, %c0_i32_0 : i32, i32, i32
  }
  func.func @transform_2(%arg0: i32, %arg1: i32) -> (i32, i32, i32) {
    %c0_i32 = arith.constant 0 : i32
    %c0_i32_0 = arith.constant 0 : i32
    %c0_i32_1 = arith.constant 0 : i32
    return %arg1, %c0_i32, %c0_i32_0 : i32, i32, i32
  }
  func.func @transform_3(%arg0: i32, %arg1: i32) -> (i32, i32, i32) {
    %c0_i32 = arith.constant 0 : i32
    %c0_i32_0 = arith.constant 0 : i32
    %c0_i32_1 = arith.constant 0 : i32
    return %arg1, %c0_i32, %c0_i32_0 : i32, i32, i32
  }
  func.func @transform_4(%arg0: i32, %arg1: i32) -> (i32, i32, i32) {
    %c0_i32 = arith.constant 0 : i32
    %c0_i32_0 = arith.constant 0 : i32
    %c0_i32_1 = arith.constant 0 : i32
    return %arg1, %c0_i32, %c0_i32_0 : i32, i32, i32
  }
  func.func @transform_5(%arg0: i32, %arg1: i32) -> (i32, i32, i32) {
    %c0_i32 = arith.constant 0 : i32
    %c0_i32_0 = arith.constant 0 : i32
    %c0_i32_1 = arith.constant 0 : i32
    return %arg1, %c0_i32, %c0_i32_0 : i32, i32, i32
  }
  func.func @transform_6(%arg0: i32, %arg1: i32) -> (i32, i32, i32) {
    %c0_i32 = arith.constant 0 : i32
    %c0_i32_0 = arith.constant 0 : i32
    %c0_i32_1 = arith.constant 0 : i32
    return %arg1, %c0_i32, %c0_i32_0 : i32, i32, i32
  }
  func.func @transform_7(%arg0: i32, %arg1: i32) -> (i32, i32, i32) {
    %c0_i32 = arith.constant 0 : i32
    %c0_i32_0 = arith.constant 0 : i32
    %c0_i32_1 = arith.constant 0 : i32
    return %arg1, %c0_i32, %c0_i32_0 : i32, i32, i32
  }
  func.func @transform_8(%arg0: i32, %arg1: i32) -> (i32, i32, i32) {
    %c0_i32 = arith.constant 0 : i32
    %c0_i32_0 = arith.constant 0 : i32
    %c0_i32_1 = arith.constant 0 : i32
    return %arg1, %c0_i32, %c0_i32_0 : i32, i32, i32
  }
  func.func @transform_9(%arg0: i32, %arg1: i32) -> (i32, i32, i32) {
    %c0_i32 = arith.constant 0 : i32
    %c0_i32_0 = arith.constant 0 : i32
    %c0_i32_1 = arith.constant 0 : i32
    return %arg1, %c0_i32, %c0_i32_0 : i32, i32, i32
  }
  func.func @transform_10(%arg0: i32, %arg1: i32) -> (i32, i32, i32) {
    %c0_i32 = arith.constant 0 : i32
    %c0_i32_0 = arith.constant 0 : i32
    %c0_i32_1 = arith.constant 0 : i32
    return %arg1, %c0_i32, %c0_i32_0 : i32, i32, i32
  }
  func.func @transform_11(%arg0: i32, %arg1: i32) -> (i32, i32, i32) {
    %c0_i32 = arith.constant 0 : i32
    %c0_i32_0 = arith.constant 0 : i32
    %c0_i32_1 = arith.constant 0 : i32
    return %arg1, %c0_i32, %c0_i32_0 : i32, i32, i32
  }
  func.func @transform_12(%arg0: i32, %arg1: i32) -> (i32, i32, i32) {
    %c0_i32 = arith.constant 0 : i32
    %c0_i32_0 = arith.constant 0 : i32
    %c0_i32_1 = arith.constant 0 : i32
    return %arg1, %c0_i32, %c0_i32_0 : i32, i32, i32
  }
  func.func @transform_13(%arg0: i32, %arg1: i32) -> (i32, i32, i32) {
    %c0_i32 = arith.constant 0 : i32
    %c0_i32_0 = arith.constant 0 : i32
    %c0_i32_1 = arith.constant 0 : i32
    return %arg1, %c0_i32, %c0_i32_0 : i32, i32, i32
  }
  func.func @transform_14(%arg0: i32, %arg1: i32) -> (i32, i32) {
    %c0_i32 = arith.constant 0 : i32
    %c0_i32_0 = arith.constant 0 : i32
    %c0_i32_1 = arith.constant 0 : i32
    return %c0_i32, %c0_i32_0 : i32, i32
  }
  func.func @transform_15(%arg0: i32, %arg1: i32) -> (i32, i32) {
    %c0_i32 = arith.constant 0 : i32
    %c0_i32_0 = arith.constant 0 : i32
    %c0_i32_1 = arith.constant 0 : i32
    return %c0_i32, %c0_i32_0 : i32, i32
  }
  func.func @transform_16(%arg0: i32, %arg1: i32) -> (i32, i32) {
    %c0_i32 = arith.constant 0 : i32
    %c0_i32_0 = arith.constant 0 : i32
    return %arg0, %c0_i32 : i32, i32
  }
  func.func @transform_17(%arg0: i32, %arg1: i32) -> (i32, i32) {
    %c0_i32 = arith.constant 0 : i32
    %c0_i32_0 = arith.constant 0 : i32
    return %arg0, %c0_i32 : i32, i32
  }
  func.func @transform_18(%arg0: i32, %arg1: i32) -> (i32, i32) {
    %c0_i32 = arith.constant 0 : i32
    %c0_i32_0 = arith.constant 0 : i32
    return %arg0, %c0_i32 : i32, i32
  }
}

</mosaic_0001>

<bundles_post_ra>
// kernel: bert_qa_forward.1
= control target key start
LH: loop header
LB: loop body
LE: loop exit
PB: predicated region body
PF: predicated region fallthrough
CT: control target
= control target key end

     0   :  { %s1770_s27 = smov 0   ;;  %s1772_s28 = smov 0   ;;  %s2001_s0 = inlined_call_operand.vmem [shape: f32[16,32], index: 0, kind: input, shape index: {}]   ;;  %s2002_s1 = inlined_call_operand.vmem [shape: f32[2,1,8], index: 1, kind: input, shape index: {}]   ;;  %s2003_s2 = inlined_call_operand.vmem [shape: bf16[2,32,96], index: 2, kind: input, shape index: {}]   ;;  %s2004_s3 = inlined_call_operand.vmem [shape: f32[2,1,96], index: 3, kind: input, shape index: {}]   ;;  %s2005_s4 = inlined_call_operand.vmem [shape: bf16[2,32,32], index: 4, kind: input, shape index: {}]   ;;  %s2006_s5 = inlined_call_operand.vmem [shape: f32[2,1,32], index: 5, kind: input, shape index: {}]   ;;  %s2007_s6 = inlined_call_operand.vmem [shape: f32[2,1,32], index: 6, kind: input, shape index: {}]   ;;  %s2008_s7 = inlined_call_operand.vmem [shape: f32[2,1,32], index: 7, kind: input, shape index: {}]   ;;  %s2009_s8 = inlined_call_operand.vmem [shape: bf16[2,32,64], index: 8, kind: input, shape index: {}]   ;;  %s2010_s9 = inlined_call_operand.vmem [shape: f32[2,1,64], index: 9, kind: input, shape index: {}]   ;;  %s2011_s10 = inlined_call_operand.vmem [shape: bf16[2,64,32], index: 10, kind: input, shape index: {}]   ;;  %s2012_s11 = inlined_call_operand.vmem [shape: f32[2,1,32], index: 11, kind: input, shape index: {}]   ;;  %s2013_s12 = inlined_call_operand.vmem [shape: f32[2,1,32], index: 12, kind: input, shape index: {}]   ;;  %s2014_s13 = inlined_call_operand.vmem [shape: f32[2,1,32], index: 13, kind: input, shape index: {}]   ;;  %s2015_s14 = inlined_call_operand.vmem [shape: f32[2,32], index: 14, kind: input, shape index: {}]   ;;  %s2016_s15 = inlined_call_operand.vmem [shape: f32[2,1], index: 15, kind: input, shape index: {}]   ;;  %s2017_s16 = inlined_call_operand.vmem [shape: f32[16,32], index: 16, kind: output, shape index: {0}]   ;;  %s2018_s17 = inlined_call_operand.vmem [shape: f32[16,1], index: 17, kind: output, shape index: {1}]   ;;  %s2019_s18 = inlined_call_operand.vmem [shape: f32[16,1], index: 18, kind: output, shape index: {2}]  }
   0x1   :  { %2025 = sst [smem:[#allocation10_spill]] %s2001_s0  ;;  %s1774_s29 = smov 0  }
   0x2   :  { %2026 = sst [smem:[#allocation11_spill]] %s2002_s1  ;;  %s1776_s30 = smov 0  }
   0x3   :  { %2027 = sst [smem:[#allocation12_spill]] %s2003_s2  ;;  %s1778_s0 = smov 0  }
   0x4   :  { %2028 = sst [smem:[#allocation13_spill]] %s2004_s3 }
   0x5   :  { %2029 = sst [smem:[#allocation14_spill]] %s2005_s4 }
   0x6   :  { %2030 = sst [smem:[#allocation15_spill]] %s2008_s7 }
   0x7   :  { %2031 = sst [smem:[#allocation16_spill]] %s2009_s8 }
   0x8   :  { %2032 = sst [smem:[#allocation17_spill]] %s2010_s9 }
   0x9   :  { %2033 = sst [smem:[#allocation18_spill]] %s2011_s10 }
   0xa   :  { %2034 = sst [smem:[#allocation19_spill]] %s2012_s11 }
   0xb   :  { %2035 = sst [smem:[#allocation20_spill]] %s2014_s13 }
   0xc   :  { %2036 = sst [smem:[#allocation21_spill]] %s2015_s14 }
   0xd   :  { %2037 = sst [smem:[#allocation22_spill]] %s2016_s15 }
   0xe   :  { %2038 = sst [smem:[#allocation23_spill]] %s2017_s16 }
   0xf   :  { %2039 = sst [smem:[#allocation24_spill]] %s2018_s17 }
  0x10   :  { %2040 = sst [smem:[#allocation25_spill]] %s2019_s18 }
  0x11 LB: > { %2041 = sst [smem:[#allocation3_spill]] %s1650_s27  ;;  %s38_s19 = sadd.s32 1, %s1658_s29  ;;  %s1666_s0 = sphi %s1778_s0, %s29_s0   ;;  %s1662_s30 = sphi %s1776_s30, %s2084_s30   ;;  %s1658_s29 = sphi %s1774_s29, %s2083_s29   ;;  %s1654_s28 = sphi %s1772_s28, %s2082_s28   ;;  %s1650_s27 = sphi %s1770_s27, %s2081_s27  }
  0x12   : > { %2042 = sst [smem:[#allocation4_spill]] %s1658_s29  ;;  %s41_s1 = sadd.s32 1, %s1662_s30 }
  0x13   : > { %2043 = sst [smem:[#allocation5_spill]] %s1662_s30  ;;  %p39_p0 = scmp.ge.s32.totalorder %s38_s19, 2 }
  0x14   : > { %2044 = sst [smem:[#allocation6_spill]] %s1666_s0  ;;  %p1477_p1 = scmp.ge.s32.totalorder %s1666_s0, 1 }
  0x15   : > { %p640_p2 = scmp.lt.s32.totalorder %s1666_s0, 5  ;;  %s2086_s19 = smov (%p39_p0, %s38_s19), 0 }
  0x16   : > { %2045 = sst [smem:[#allocation7_spill]] %s2086_s19  ;;  %s2088_s1 = smov (!%p39_p0, %s41_s1), %s1662_s30 }
  0x17   : > { %p641_p3 = pnand %p1477_p1, %p640_p2  ;;  %p43_p4 = scmp.ge.s32.totalorder %s2088_s1, 2 }
  0x19   : > { %s2090_s1 = smov (%p43_p4, %s2088_s1), 0  ;;  %644 = sbr.rel (%p641_p3) target bundleno = 2045 (0x7fd), region = 84 }
  0x1a   : > { %2046 = sst [smem:[#allocation8_spill]] %s2090_s1 }
  0x1e   : > { %p747_p5 = scmp.lt.s32.totalorder %s1654_s28, 1  ;;  %p754_p6 = scmp.lt.s32.totalorder %s1650_s27, 1 }
  0x1f   : > { %s2049_s1 = sld [smem:[#allocation10_spill]] }
  0x20   : > { %s2092_s28 = smov (!%p747_p5, %s1654_s28), 1  ;;  %s2050_s15 = sld [smem:[#allocation12_spill]] }
  0x21   : > { %2047 = sst [smem:[#allocation9_spill]] %s2092_s28  ;;  %s1809_s21 = sshll.u32 %s2092_s28, 3 }
  0x22   : > { %s1806_s20 = scalar_select %p754_p6, %s1650_s27, 1 }
  0x23   : > { %s2051_s3 = sld [smem:[#allocation13_spill]] }
  0x24   : > { %s1542_s30 = sshll.u32 %s1806_s20, 4  ;;  %s2052_s4 = sld [smem:[#allocation14_spill]] }
  0x25   : > { %s750_s19 = scalar_lea.vmem %s2049_s1, %s1809_s21  ;;  %s2054_s8 = sld [smem:[#allocation16_spill]] }
  0x26   : > { %s758_s14 = scalar_lea.vmem %s2050_s15, %s1542_s30  ;;  %s2057_s10 = sld [smem:[#allocation18_spill]] }
  0x27   : > { %s794_s13 = scalar_lea.vmem %s2013_s12, %s1806_s20  ;;  %s2058_s15 = sld [smem:[#allocation20_spill]] }
  0x28   : > { %s2060_s1 = sld [smem:[#allocation24_spill]] }
  0x29   : > { %s761_s17 = scalar_lea.vmem %s2051_s3, %s1806_s20  ;;  %s2059_s3 = sld [smem:[#allocation23_spill]] }
  0x2a   : > { %s1830_s23 = scalar_lea.vmem %s2052_s4, %s1542_s30  ;;  %s1545_s4 = sshll.u32 %s1806_s20, 5 }
  0x2b   : > { %s1847_s27 = scalar_lea.vmem %s2054_s8, %s1542_s30  ;;  %s2061_s26 = sld [smem:[#allocation25_spill]] }
  0x2c   : > { %s1861_s16 = scalar_lea.vmem %s2057_s10, %s1545_s4  ;;  %s2062_s7 = sld [smem:[#allocation3_spill]] }
  0x2d   : > { %s797_s8 = scalar_lea.vmem %s2058_s15, %s1806_s20 }
  0x2e   : > { %s805_s11 = scalar_lea.vmem %s2060_s1, %s1809_s21 }
  0x2f   : > { %s1875_s9 = scalar_lea.vmem %s2059_s3, %s1809_s21 }
  0x31   : > { %s809_s10 = scalar_lea.vmem %s2061_s26, %s1809_s21 }
  0x32   : > { %p1490_p7 = scmp.ne.s32.totalorder %s2062_s7, 0 }
  0x34   : > { %814 = sbr.rel (%p1490_p7) target bundleno = 59 (0x3b), region = 88 }
  0x39   : > { %v815_v0 = vld [vmem:[%s750_s19] sm:$0xff]  ;;  %vm816_vm0 = vcmask 261120  }
  0x3a   : > { %817 = vst.msk [vmem:[%s1875_s9] sm:$0xff] %vm816_vm0, %v815_v0 }
  0x3b PF: > { %v1547_v1 = vld [vmem:[%s758_s14 + $0x8] sm:$0xff]  ;;  %v1546_v2 = vld [vmem:[%s758_s14] sm:$0xff]  ;;  %vm840_vm1 = vcmask 261120   ;;  %s1668_s3 = smov 112   ;;  %s1669_s7 = smov 96   ;;  %vm865_vm2 = vcmask 130048  }
  0x3c   : > { %850 = vmatpush.bf16.msra.mxu0 %v1547_v1  ;;  %v1603_v5 = vld [vmem:[%s761_s17] ss:$0 sm:$0xff]  ;;  %s1670_s14 = smov 80   ;;  %s1671_s19 = smov 64   ;;  %vm903_vm3 = vcmask 1043456   ;;  %vm885_vm4 = vcmask 64512  }
  0x3d   : > { %s1672_s1 = smov 48   ;;  %s2063_s15 = sld [smem:[#allocation9_spill]]  ;;  %v1549_v46 = vld [vmem:[%s1830_s23 + $0x8] sm:$0xff]  ;;  %v1548_v51 = vld [vmem:[%s1830_s23] sm:$0xff]  ;;  %vm981_vm5 = vcmask 261248   ;;  %v1674_v61 = vmov 32.0  }
  0x3e   : > { %s2064_s0 = sld [smem:[#allocation11_spill]]  ;;  %s1673_s18 = smov 16   ;;  %vm1144_vm10 = vcmask 523264  }
  0x3f   : > { %s2066_s24 = scalar_lea.vmem %s2006_s5, %s1806_s20  ;;  %s2067_s25 = scalar_lea.vmem %s2007_s6, %s1806_s20 }
  0x40   : > { %851 = vmatpush.bf16.msra.mxu0 %v1546_v2  ;;  %v1605_v55 = vld [vmem:[%s2066_s24] ss:$0 sm:$0xff]  ;;  %s2068_s26 = sld [smem:[#allocation15_spill]] }
  0x41   : > { %v1888_v3 = vld [vmem:[%s1875_s9] sm:$0xff]  ;;  %s2072_s17 = sld [smem:[#allocation19_spill]] }
  0x42   : > { %v819_v4 = vpack.c.bf16 %v1888_v3, %v1888_v3  ;;  %s2075_s24 = sld [smem:[#allocation3_spill]] }
  0x44   : > { %1499 = vmatmul.msk.bf16.vlgmr.msra.gmra.mxu0 %vm840_vm1, %v819_v4  ;;  %s2065_s30 = scalar_lea.vmem %s2064_s0, %s2063_s15 }
  0x45   : > { %v1604_v19 = vld [vmem:[%s2065_s30] ss:$0 sm:$0xff]  ;;  %1014 = vmatpush.bf16.msrb.mxu0 %v1549_v46 }
  0x47   : > { %s2073_s29 = scalar_lea.vmem %s2072_s17, %s1806_s20 }
  0x48   : > { %p1539_p8 = scmp.ne.s32.totalorder %s2075_s24, 1 }
  0x49   : > { %1015 = vmatpush.bf16.msrb.mxu0 %v1548_v51 }
  0xc1   : > { %v853_v6 = vpop.f32.mrf.mxu0 }
  0xc2   : > { %v854_v7 = vadd.f32 %v1603_v5, %v853_v6 }
  0xc4   : > { %v858_v8 = vpack.c.bf16 %v854_v7, %v854_v7 }
  0xc6   : > { %921 = vrot.lane.b32.xlu1 %v858_v8, %s1668_s3  ;;  %863 = vrot.lane.b32.xlu0 %v858_v8, %s1669_s7  ;;  %s2069_s3 = scalar_lea.vmem %s2068_s26, %s1806_s20 }
  0xc9   : > { %v855_v9 = vpop.f32.mrf.mxu0 }
  0xca   : > { %v1551_v9 = vld [vmem:[%s1847_s27 + $0x8] sm:$0xff] }
  0xce   : > { %923 = vrot.lane.b32.xlu0 %v858_v8, %s1670_s14 }
  0xd6   : > { %898 = vrot.lane.b32.xlu0 %v858_v8, %s1671_s19  ;;  %s2070_s19 = sld [smem:[#allocation17_spill]] }
  0xde   : > { %956 = vrot.lane.b32.xlu0 %v858_v8, %s1672_s1  ;;  %s2071_s1 = scalar_lea.vmem %s2070_s19, %s1806_s20  ;;  %s2077_s20 = sld [smem:[#allocation22_spill]] (!%p1539_p8) }
 0x138   : > { %v864_v10 = vpop.permute.xlu0 %863  ;;  %v922_v14 = vpop.permute.xlu1 %921 }
 0x139   : > { %v870_v11 = vsel %vm865_vm2, %v864_v10, 0  ;;  %v1550_v10 = vld [vmem:[%s1847_s27] sm:$0xff] }
 0x13a   : > { %879 = vmatpush.bf16.xpose.msra.mxu1 %v870_v11 }
 0x140   : > { %v924_v12 = vpop.permute.xlu0 %923 }
 0x141   : > { %1500 = vmatmul.msk.bf16.vlgmr.msra.gmra.mxu1 %vm865_vm2, %v858_v8  ;;  %v929_v13 = vsel %vm865_vm2, %v924_v12, 0 }
 0x142   : > { %938 = vmatpush.bf16.xpose.msra.mxu3 %v929_v13  ;;  %1091 = vmatpush.bf16.msrb.mxu1 %v1551_v9 }
 0x146   : > { %1092 = vmatpush.bf16.msrb.mxu1 %v1550_v10 }
 0x148   : > { %v899_v15 = vpop.permute.xlu0 %898 }
 0x149   : > { %1502 = vmatmul.msk.bf16.vlgmr.msra.gmra.mxu3 %vm865_vm2, %v922_v14  ;;  %v905_v16 = vsel %vm903_vm3, %v899_v15, 0 }
 0x14a   : > { %914 = vmatpush.bf16.msra.mxu2 %v905_v16 }
 0x150   : > { %v957_v17 = vpop.permute.xlu0 %956 }
 0x151   : > { %v962_v18 = vsel %vm903_vm3, %v957_v17, 0 }
 0x152   : > { %971 = vmatpush.bf16.msrb.mxu2 %v962_v18 }
 0x1be   : > { %v881_v20 = vpop.f32.mrf.mxu1 }
 0x1bf   : > { %v882_v21 = vadd.f32 %v1604_v19, %v881_v20  ;;  %v1606_v20 = vld [vmem:[%s2067_s25] ss:$0 sm:$0xff]  ;;  %s2076_s25 = sld [smem:[#allocation21_spill]] (!%p1539_p8) }
 0x1c1   : > { %v886_v22 = vsel %vm885_vm4, %v882_v21, -inf }
 0x1c2   : > { %887 = vmax.xlane.f32.xlu1 %v886_v22 }
 0x1c6   : > { %v883_v23 = vpop.f32.mrf.mxu1 }
 0x1c7   : > { %v1607_v23 = vld [vmem:[%s2069_s3] ss:$0 sm:$0xff] }
 0x1cc   : > { %v940_v24 = vpop.f32.mrf.mxu3 }
 0x1cd   : > { %v941_v25 = vadd.f32 %v1604_v19, %v940_v24 }
 0x1cf   : > { %v944_v26 = vsel %vm885_vm4, %v941_v25, -inf }
 0x1d0   : > { %945 = vmax.xlane.f32.xlu2 %v944_v26 }
 0x1d4   : > { %v942_v27 = vpop.f32.mrf.mxu3 }
 0x1d5   : > { %v1555_v27 = vld [vmem:[%s1861_s16 + $0x18] sm:$0xff] }
 0x1d6   : > { %1152 = vmatpush.bf16.msrb.mxu3 %v1555_v27 }
 0x235   : > { %v888_v28 = vpop.xlane.xlu1 %887 }
 0x236   : > { %v889_v29 = vsub.f32 %v882_v21, %v888_v28  ;;  %v1554_v28 = vld [vmem:[%s1861_s16 + $0x10] sm:$0xff] }
 0x237   : > { %1153 = vmatpush.bf16.msrb.mxu3 %v1554_v28 }
 0x238   : > { %v890_v30 = vmul.f32 1.442695, %v889_v29  ;;  %v1553_v29 = vld [vmem:[%s1861_s16 + $0x8] sm:$0xff] }
 0x23a   : > { %1612 = vpow2.f32 %v890_v30  ;;  %v1552_v30 = vld [vmem:[%s1861_s16] sm:$0xff] }
 0x23b   : > { %1154 = vmatpush.bf16.msrb.mxu3 %v1553_v29 }
 0x23f   : > { %1155 = vmatpush.bf16.msrb.mxu3 %v1552_v30 }
 0x240   : > { %v1613_v31 = vpop.eup %1612 }
 0x241   : > { %v892_v32 = vsel %vm885_vm4, %v1613_v31, 0.0 }
 0x242   : > { %893 = vadd.xlane.f32.xlu2 %v892_v32 }
 0x243   : > { %v946_v33 = vpop.xlane.xlu2 %945 }
 0x244   : > { %v947_v34 = vsub.f32 %v941_v25, %v946_v33 }
 0x246   : > { %v948_v35 = vmul.f32 1.442695, %v947_v34 }
 0x248   : > { %1614 = vpow2.f32 %v948_v35 }
 0x24e   : > { %v1615_v36 = vpop.eup %1614 }
 0x24f   : > { %v950_v37 = vsel %vm885_vm4, %v1615_v36, 0.0 }
 0x250   : > { %951 = vadd.xlane.f32.xlu2 %v950_v37 }
 0x2b5   : > { %v894_v38 = vpop.xlane.xlu2 %893 }
 0x2b6   : > { %1616 = vrcp.f32 %v894_v38 }
 0x2bc   : > { %v1617_v39 = vpop.eup %1616 }
 0x2bd   : > { %v896_v40 = vmul.f32 %v1617_v39, %v1613_v31  ;;  %v1608_v31 = vld [vmem:[%s2071_s1] ss:$0 sm:$0xff] }
 0x2bf   : > { %v897_v41 = vpack.c.bf16 %v896_v40, %v896_v40 }
 0x2c1   : > { %1501 = vmatmul.msk.bf16.vlgmr.msra.gmra.mxu2 %vm885_vm4, %v897_v41 }
 0x2c3   : > { %v952_v42 = vpop.xlane.xlu2 %951 }
 0x2c4   : > { %1618 = vrcp.f32 %v952_v42 }
 0x2c5   : > { %1620 = vrcp.f32 %v1674_v61 }
 0x2ca   : > { %v1619_v43 = vpop.eup %1618 }
 0x2cb   : > { %v954_v44 = vmul.f32 %v1619_v43, %v1615_v36  ;;  %v1621_v62 = vpop.eup %1620 }
 0x2cc   : > { %v1028_v63 = vmul.f32 32.0, %v1621_v62  ;;  %vm1032_vm6 = vweird.f32 %v1621_v62 }
 0x2cd   : > { %v955_v45 = vpack.c.bf16 %v954_v44, %v954_v44 }
 0x2ce   : > { %v1029_v0 = vsub.f32 1.0, %v1028_v63 }
 0x2d0   : > { %v1030_v1 = vmul.f32 %v1621_v62, %v1029_v0 }
 0x2d1   : > { %1503 = vmatmul.msk.bf16.vlgmr.msrb.gmra.mxu2 %vm885_vm4, %v955_v45  ;;  %v1609_v45 = vld [vmem:[%s2073_s29] ss:$0 sm:$0xff] }
 0x2d2   : > { %v1031_v2 = vadd.f32 %v1621_v62, %v1030_v1  ;;  %v1610_v1 = vld [vmem:[%s794_s13] ss:$0 sm:$0xff] }
 0x2d4   : > { %v1919_v4 = vsel %vm1032_vm6, %v1621_v62, %v1031_v2 }
 0x344   : > { %v916_v47 = vpop.f32.mrf.mxu2 }
 0x345   : > { %920 = vst.msk [vmem:[#allocation2] sm:$0xff] %vm865_vm2, %v916_v47 }
 0x34c   : > { %v918_v48 = vpop.f32.mrf.mxu2 }
 0x354   : > { %v973_v49 = vpop.f32.mrf.mxu2 }
 0x355   : > { %978 = vrot.lane.b32.xlu2 %v973_v49, %s1673_s18 }
 0x35c   : > { %v975_v50 = vpop.f32.mrf.mxu2 }
 0x3af   : > { %v979_v52 = vpop.permute.xlu2 %978 }
 0x3b0   : > { %982 = vst.msk [vmem:[#allocation2] sm:$0xff] %vm981_vm5, %v979_v52 }
 0x3b7   : > { %v983_v53 = vld [vmem:[#allocation2] sm:$0xff] }
 0x3b8   : > { %v984_v54 = vpack.c.bf16 %v983_v53, %v983_v53 }
 0x3ba   : > { %1512 = vmatmul.msk.bf16.vlgmr.msrb.gmra.mxu0 %vm840_vm1, %v984_v54 }
 0x437   : > { %v1017_v56 = vpop.f32.mrf.mxu0 }
 0x438   : > { %v1018_v57 = vadd.f32 %v1605_v55, %v1017_v56 }
 0x43a   : > { %v1021_v58 = vadd.f32 %v1018_v57, %v1888_v3 }
 0x43c   : > { %v1024_v59 = vsel %vm840_vm1, %v1021_v58, 0.0 }
 0x43d   : > { %1025 = vadd.xlane.f32.xlu0 %v1024_v59 }
 0x43f   : > { %v1019_v60 = vpop.f32.mrf.mxu0 }
 0x4b0   : > { %v1026_v5 = vpop.xlane.xlu0 %1025 }
 0x4b1   : > { %v1034_v6 = vmul.f32 %v1919_v4, %v1026_v5 }
 0x4b3   : > { %v1035_v3 = vsub.f32 %v1021_v58, %v1034_v6 }
 0x4b5   : > { %v1036_v7 = vmul.f32 %v1035_v3, %v1035_v3 }
 0x4b7   : > { %v1037_v8 = vsel %vm840_vm1, %v1036_v7, 0.0 }
 0x4b8   : > { %1038 = vadd.xlane.f32.xlu2 %v1037_v8 }
 0x52b   : > { %v1039_v11 = vpop.xlane.xlu2 %1038 }
 0x52c   : > { %v1040_v12 = vmul.f32 %v1039_v11, %v1919_v4 }
 0x52e   : > { %v1041_v13 = vadd.f32 1e-12, %v1040_v12 }
 0x530   : > { %1622 = vrsqrt.f32 %v1041_v13  ;;  %vm1048_vm8 = vweird.f32 %v1041_v13 }
 0x536   : > { %v1623_v14 = vpop.eup %1622 }
 0x537   : > { %v1043_v15 = vmul.f32 %v1623_v14, %v1041_v13  ;;  %vm1049_vm7 = vweird.f32 %v1623_v14 }
 0x538   : > { %vm1050_vm9 = vmor %vm1048_vm8, %vm1049_vm7 }
 0x539   : > { %v1044_v16 = vmul.f32 %v1623_v14, %v1043_v15 }
 0x53b   : > { %v1045_v17 = vmul.f32 0.5, %v1044_v16 }
 0x53d   : > { %v1046_v18 = vsub.f32 1.5, %v1045_v17 }
 0x53f   : > { %v1047_v19 = vmul.f32 %v1623_v14, %v1046_v18 }
 0x541   : > { %v1051_v21 = vsel %vm1050_vm9, %v1623_v14, %v1047_v19 }
 0x542   : > { %v1052_v22 = vmul.f32 %v1051_v21, %v1035_v3 }
 0x544   : > { %v1056_v24 = vmul.f32 %v1606_v20, %v1052_v22 }
 0x546   : > { %v1060_v25 = vadd.f32 %v1607_v23, %v1056_v24 }
 0x548   : > { %v1061_v26 = vpack.c.bf16 %v1060_v25, %v1060_v25 }
 0x54a   : > { %1521 = vmatmul.msk.bf16.vlgmr.msrb.gmra.mxu1 %vm840_vm1, %v1061_v26 }
 0x5c7   : > { %v1094_v32 = vpop.f32.mrf.mxu1 }
 0x5c8   : > { %v1095_v33 = vadd.f32 %v1608_v31, %v1094_v32 }
 0x5ca   : > { %v1098_v34 = vmul.f32 %v1095_v33, %v1095_v33 }
 0x5cc   : > { %v1099_v35 = vmul.f32 %v1098_v34, %v1095_v33 }
 0x5ce   : > { %v1100_v36 = vmul.f32 0.044715, %v1099_v35 }
 0x5cf   : > { %v1096_v37 = vpop.f32.mrf.mxu1 }
 0x5d0   : > { %v1101_v38 = vadd.f32 %v1100_v36, %v1095_v33 }
 0x5d2   : > { %v1102_v39 = vmul.f32 0.7978846, %v1101_v38 }
 0x5d4   : > { %1624 = vtanh.f32 %v1102_v39 }
 0x5da   : > { %v1625_v40 = vpop.eup %1624 }
 0x5db   : > { %v1104_v41 = vadd.f32 1.0, %v1625_v40 }
 0x5dd   : > { %v1105_v42 = vmul.f32 0.5, %v1104_v41 }
 0x5df   : > { %v1106_v43 = vmul.f32 %v1105_v42, %v1095_v33 }
 0x5e1   : > { %v1107_v44 = vpack.c.bf16 %v1106_v43, %v1106_v43 }
 0x5e3   : > { %1538 = vmatmul.msk.bf16.vlgmr.msrb.gmra.mxu3 %vm1144_vm10, %v1107_v44 }
 0x666   : > { %v1157_v46 = vpop.f32.mrf.mxu3 }
 0x667   : > { %v1158_v47 = vadd.f32 %v1609_v45, %v1157_v46 }
 0x669   : > { %v1161_v48 = vadd.f32 %v1158_v47, %v1060_v25 }
 0x66b   : > { %v1164_v49 = vsel %vm840_vm1, %v1161_v48, 0.0 }
 0x66c   : > { %1165 = vadd.xlane.f32.xlu1 %v1164_v49 }
 0x66e   : > { %v1159_v50 = vpop.f32.mrf.mxu3 }
 0x6df   : > { %v1166_v51 = vpop.xlane.xlu1 %1165 }
 0x6e0   : > { %v1167_v52 = vmul.f32 %v1166_v51, %v1919_v4 }
 0x6e2   : > { %v1168_v53 = vsub.f32 %v1161_v48, %v1167_v52 }
 0x6e4   : > { %v1169_v54 = vmul.f32 %v1168_v53, %v1168_v53 }
 0x6e6   : > { %v1170_v55 = vsel %vm840_vm1, %v1169_v54, 0.0 }
 0x6e7   : > { %1171 = vadd.xlane.f32.xlu1 %v1170_v55 }
 0x75a   : > { %v1172_v56 = vpop.xlane.xlu1 %1171 }
 0x75b   : > { %v1173_v57 = vmul.f32 %v1172_v56, %v1919_v4  ;;  %v1611_v4 = vld [vmem:[%s797_s8] ss:$0 sm:$0xff] }
 0x75d   : > { %v1174_v58 = vadd.f32 1e-12, %v1173_v57 }
 0x75f   : > { %1626 = vrsqrt.f32 %v1174_v58  ;;  %vm1181_vm12 = vweird.f32 %v1174_v58 }
 0x765   : > { %v1627_v59 = vpop.eup %1626 }
 0x766   : > { %v1176_v60 = vmul.f32 %v1627_v59, %v1174_v58  ;;  %vm1182_vm11 = vweird.f32 %v1627_v59 }
 0x767   : > { %vm1183_vm13 = vmor %vm1181_vm12, %vm1182_vm11 }
 0x768   : > { %v1177_v61 = vmul.f32 %v1627_v59, %v1176_v60 }
 0x76a   : > { %v1178_v62 = vmul.f32 0.5, %v1177_v61 }
 0x76c   : > { %v1179_v63 = vsub.f32 1.5, %v1178_v62 }
 0x76e   : > { %v1180_v0 = vmul.f32 %v1627_v59, %v1179_v63 }
 0x770   : > { %v1184_v2 = vsel %vm1183_vm13, %v1627_v59, %v1180_v0 }
 0x771   : > { %v1185_v5 = vmul.f32 %v1184_v2, %v1168_v53 }
 0x773   : > { %v1189_v6 = vmul.f32 %v1610_v1, %v1185_v5  ;;  %1198 = sbr.rel (%p1539_p8) target bundleno = 2045 (0x7fd), region = 92 }
 0x775   : > { %v1193_v3 = vadd.f32 %v1611_v4, %v1189_v6 }
 0x777   : > { %1194 = vst.msk [vmem:[%s1875_s9] sm:$0xff] %vm840_vm1, %v1193_v3 }
 0x778   : > { %v1199_v7 = vld [vmem:[%s2076_s25] sm:$0x3]  ;;  %vm1208_vm14 = vcmask 7168  }
 0x779   : > { %v1201_v8 = vperm.slane %v1199_v7, 0  ;;  %v1210_v10 = vperm.slane %v1199_v7, 1  ;;  %v1200_v14 = vld [vmem:[%s2077_s20] sm:$0x3] }
 0x77a   : > { %v1206_v15 = vperm.slane %v1200_v14, 0  ;;  %v1215_v18 = vperm.slane %v1200_v14, 1 }
 0x77b   : > { %v1202_v9 = vmul.f32 %v1201_v8, %v1193_v3  ;;  %v1211_v12 = vmul.f32 %v1210_v10, %v1193_v3 }
 0x77d   : > { %v1203_v11 = vsel %vm840_vm1, %v1202_v9, 0.0  ;;  %v1212_v13 = vsel %vm840_vm1, %v1211_v12, 0.0 }
 0x77e   : > { %1204 = vadd.xlane.f32.xlu0 %v1203_v11 }
 0x786   : > { %1213 = vadd.xlane.f32.xlu0 %v1212_v13 }
 0x7f1   : > { %v1205_v16 = vpop.xlane.xlu0 %1204 }
 0x7f2   : > { %v1207_v17 = vadd.f32 %v1206_v15, %v1205_v16 }
 0x7f4   : > { %1209 = vst.msk [vmem:[%s805_s11] sm:$0xff] %vm1208_vm14, %v1207_v17 }
 0x7f9   : > { %v1214_v19 = vpop.xlane.xlu0 %1213 }
 0x7fa   : > { %v1216_v20 = vadd.f32 %v1215_v18, %v1214_v19 }
 0x7fc   : > { %1217 = vst.msk [vmem:[%s809_s10] sm:$0xff] %vm1208_vm14, %v1216_v20 }
 0x7fd PF: > { %s2080_s14 = sld [smem:[#allocation6_spill]] }
 0x7fe   : > { %s2081_s27 = sld [smem:[#allocation4_spill]] }
 0x7ff   : > { %s2082_s28 = sld [smem:[#allocation5_spill]] }
 0x800   : > { %s2083_s29 = sld [smem:[#allocation7_spill]] }
 0x801   : > { %s2084_s30 = sld [smem:[#allocation8_spill]] }
 0x803   : > { %s29_s0 = sadd.s32 1, %s2080_s14  }
 0x804   : > { %p26_p9 = scmp.ge.s32.totalorder %s29_s0, 6  }
 0x806   :  { %28 = sbr.rel (!%p26_p9) target bundleno = 17 (0x11), region = 185 }

</bundles_post_ra>
